<compile_context>
chip_gen: v5e
topology: v5e:2x2
jax: 0.10.0
libtpu: 0.0.40
codegen_flags: <defaults>
</compile_context>

<pallas_src>
import functools
import numpy as np
import jax
import jax.numpy as jnp
from jax import lax
from jax.experimental import pallas as pl
from jax.experimental.pallas import tpu as pltpu

_LANE = 128
_SUBLANE = 8


def _round_up(n, m):
    return (n + m - 1) // m * m


def _tpu_vmem_capacity():
    """Physical VMEM bytes per core (trace-time query, conservative fallback)."""
    try:
        return int(pltpu.get_tpu_info().vmem_capacity_bytes)
    except Exception:
        return 64 << 20  # v7x per-TensorCore


def _default_tile_b():
    # v5e/v6e (128 MiB VMEM): big tiles amortize per-grid-step overhead.
    # v7x / unknown (<= 64 MiB): smaller tile keeps working set under budget.
    return 1024 if _tpu_vmem_capacity() >= (128 << 20) else 256


def _vmem_limit_bytes(tb, d, hp):
    """Explicit scoped-VMEM limit: tile working set with generous headroom."""
    x_io = 2 * tb * d * 4            # double-buffered x tile (f32)
    w_io = 2 * 2 * d * hp * 2        # We^T + Wd, bf16, double-buffered
    g_io = 2 * hp * hp * 4           # G / M block (budgeted as f32)
    misc = 2 * tb * 4 + 2 * _SUBLANE * _LANE * 4
    tmp = tb * d * 2 + 6 * tb * hp * 4   # bf16 x copy + a/c/hM/hG temporaries
    est = x_io + w_io + g_io + misc + tmp
    cap = _tpu_vmem_capacity() - (4 << 20)
    return int(max(32 << 20, min(cap, 2 * est + (2 << 20))))


def _batch_tiling(B, tile_b):
    """Return (Bp, TB, n_tiles): padded batch, batch tile, tile count."""
    if B <= tile_b:
        tb = _round_up(B, _SUBLANE)
        return tb, tb, 1
    tb = _round_up(tile_b, _SUBLANE)
    n_tiles = -(-B // tb)
    if n_tiles > 1 and n_tiles % 2 == 1:
        # Even tile count so dimension_semantics=("parallel",) can shard across
        # both v7x TensorCores without a straggler tile.
        n_tiles += 1
        tb = _round_up(-(-B // n_tiles), _SUBLANE)
    return n_tiles * tb, tb, n_tiles


def _prep_weights(w_enc, w_dec):
    """Pre-transpose + zero-pad hidden dim to a lane multiple; hoist G = Wd^T Wd."""
    H, _ = w_enc.shape
    Hp = _round_up(H, _LANE)
    we_t = w_enc.T                                  # (D, H)  == encoder.weight^T
    if Hp != H:
        we_t = jnp.pad(we_t, ((0, 0), (0, Hp - H)))
        w_dec = jnp.pad(w_dec, ((0, 0), (0, Hp - H)))
    g = w_dec.T @ w_dec                             # (Hp, Hp), batch-independent
    return we_t.astype(jnp.bfloat16), w_dec.astype(jnp.bfloat16), g, Hp


# ----------------------------------------------------------------------------
# Kernel 1: sampled nested-dropout reconstruction loss (default forward path),
# tile-local trace form.  One grid step handles TB rows of x and stores its
# partial squared-error sum broadcast into a lane-dense (1, 8, 128) slab.
# ----------------------------------------------------------------------------
def _nested_dropout_loss_kernel(x_ref, wet_ref, wd_ref, g_ref, inds_ref,
                                partial_ref):
    x = x_ref[...]                                  # (TB, D)  f32
    x16 = x.astype(jnp.bfloat16)
    wet = wet_ref[...]                              # (D, Hp)  bf16  We^T
    wd = wd_ref[...]                                # (D, Hp)  bf16  Wd
    g = g_ref[...]                                  # (Hp, Hp) bf16  Wd^T Wd
    inds = inds_ref[...]                            # (TB, 1)  int32

    # Canonical contractions, bf16 operands, f32 accumulation on the MXU.
    a = jnp.dot(x16, wet, preferred_element_type=jnp.float32)   # x @ We^T
    c = jnp.dot(x16, wd, preferred_element_type=jnp.float32)    # x @ Wd

    # Nested-dropout mask: keep unit j of row b iff prior_inds[b] >= j.
    j = lax.broadcasted_iota(jnp.int32, a.shape, 1)
    hm = jnp.where(j <= inds, a, 0.0)                            # f32

    hg = jnp.dot(hm.astype(jnp.bfloat16), g,
                 preferred_element_type=jnp.float32)             # hM @ G

    # sum((x - hM Wd^T)^2) = sum(x*x) + sum(hM * (hM@G - 2*(x@Wd)))
    s = jnp.sum(x * x) + jnp.sum(hm * (hg - 2.0 * c))

    # Scalar broadcast into the whole (1,8,128) slab (unmasked lane-dense vst);
    # the wrapper reads partial[:, 0, 0] — keep these two in sync.
    partial_ref[...] = jnp.full(partial_ref.shape, s, dtype=jnp.float32)


# ----------------------------------------------------------------------------
# Kernel 2: expectation path (use_expectation=True), fused trace identities.
# ----------------------------------------------------------------------------
def _expectation_loss_kernel(x_ref, wet_ref, wd_ref, cp_ref, m_ref, partial_ref):
    x = x_ref[...]                                  # (TB, D)  f32
    x16 = x.astype(jnp.bfloat16)
    wet = wet_ref[...]                              # (D, Hp)  bf16  We^T
    wd = wd_ref[...]                                # (D, Hp)  bf16  Wd
    cp = cp_ref[...]                                # (1, Hp)  f32   cum_probs
    m = m_ref[...]                                  # (Hp, Hp) bf16  (Wd^T Wd)*l_mask

    a = jnp.dot(x16, wet, preferred_element_type=jnp.float32)   # (TB, Hp)
    c = jnp.dot(x16, wd, preferred_element_type=jnp.float32)    # (TB, Hp)
    am = jnp.dot(a.astype(jnp.bfloat16), m,
                 preferred_element_type=jnp.float32)            # (TB, Hp)

    # tr(X^T X) - 2 tr(A^T X Wd diag(cp)) + tr(A^T A M), one fused Hp-wide reduce.
    s = jnp.sum(x * x) + jnp.sum(a * (am - 2.0 * (c * cp)))
    partial_ref[...] = jnp.full(partial_ref.shape, s, dtype=jnp.float32)


# ----------------------------------------------------------------------------
# Wrappers
# ----------------------------------------------------------------------------
@functools.partial(jax.jit, static_argnames=("tile_b",))
def _sampled_loss_impl(x, w_enc, w_dec, prior_inds, *, tile_b):
    B, D = x.shape
    we_t, wd, g, Hp = _prep_weights(w_enc, w_dec)
    g = g.astype(jnp.bfloat16)
    Bp, TB, n_tiles = _batch_tiling(B, tile_b)
    if Bp != B:
        x = jnp.pad(x, ((0, Bp - B), (0, 0)))           # zero rows -> zero loss
        prior_inds = jnp.pad(prior_inds, (0, Bp - B))
    inds2d = prior_inds.astype(jnp.int32).reshape(Bp, 1)

    cost = pl.CostEstimate(
        flops=int(4 * Bp * D * Hp + 2 * Bp * Hp * Hp),
        transcendentals=0,
        bytes_accessed=int(4 * Bp * D + 2 * 2 * D * Hp + 2 * Hp * Hp + 4 * Bp
                           + 4 * n_tiles * _SUBLANE * _LANE),
    )

    partial = pl.pallas_call(
        _nested_dropout_loss_kernel,
        grid=(n_tiles,),
        in_specs=[
            pl.BlockSpec((TB, D), lambda b: (b, 0)),
            pl.BlockSpec((D, Hp), lambda b: (0, 0)),
            pl.BlockSpec((D, Hp), lambda b: (0, 0)),
            pl.BlockSpec((Hp, Hp), lambda b: (0, 0)),
            pl.BlockSpec((TB, 1), lambda b: (b, 0)),
        ],
        out_specs=pl.BlockSpec((1, _SUBLANE, _LANE), lambda b: (b, 0, 0)),
        out_shape=jax.ShapeDtypeStruct((n_tiles, _SUBLANE, _LANE), jnp.float32),
        compiler_params=pltpu.CompilerParams(
            dimension_semantics=("parallel",),
            vmem_limit_bytes=_vmem_limit_bytes(TB, D, Hp)),
        cost_estimate=cost,
    )(x, we_t, wd, g, inds2d)

    # Per-tile partial sums -> total; multiply by precomputed 1/B.
    return jnp.sum(partial[:, 0, 0]) * (1.0 / B)


def nested_dropout_recon_loss(x, w_enc, w_dec, prior_inds, *, tile_b=None):
    if tile_b is None:
        tile_b = _default_tile_b()
    return _sampled_loss_impl(x, w_enc, w_dec, prior_inds, tile_b=int(tile_b))


@functools.partial(jax.jit, static_argnames=("tile_b",))
def _expectation_loss_impl(x, w_enc, w_dec, cum_probs, l_mask, *, tile_b):
    B, D = x.shape
    H = w_enc.shape[0]
    we_t, wd, g, Hp = _prep_weights(w_enc, w_dec)
    Bp, TB, n_tiles = _batch_tiling(B, tile_b)
    if Bp != B:
        x = jnp.pad(x, ((0, Bp - B), (0, 0)))

    # Batch-independent precompute hoisted out of the kernel.
    if Hp != H:
        l_mask = jnp.pad(l_mask, ((0, Hp - H), (0, Hp - H)))
        cum_probs = jnp.pad(cum_probs, (0, Hp - H))
    m = (g * l_mask).astype(jnp.bfloat16)                  # (Hp, Hp)
    cp_row = cum_probs.astype(jnp.float32).reshape(1, Hp)

    cost = pl.CostEstimate(
        flops=int(4 * Bp * D * Hp + 2 * Bp * Hp * Hp),
        transcendentals=0,
        bytes_accessed=int(4 * Bp * D + 2 * 2 * D * Hp + 2 * Hp * Hp + 4 * Hp
                           + 4 * n_tiles * _SUBLANE * _LANE),
    )

    partial = pl.pallas_call(
        _expectation_loss_kernel,
        grid=(n_tiles,),
        in_specs=[
            pl.BlockSpec((TB, D), lambda b: (b, 0)),
            pl.BlockSpec((D, Hp), lambda b: (0, 0)),
            pl.BlockSpec((D, Hp), lambda b: (0, 0)),
            pl.BlockSpec((1, Hp), lambda b: (0, 0)),
            pl.BlockSpec((Hp, Hp), lambda b: (0, 0)),
        ],
        out_specs=pl.BlockSpec((1, _SUBLANE, _LANE), lambda b: (b, 0, 0)),
        out_shape=jax.ShapeDtypeStruct((n_tiles, _SUBLANE, _LANE), jnp.float32),
        compiler_params=pltpu.CompilerParams(
            dimension_semantics=("parallel",),
            vmem_limit_bytes=_vmem_limit_bytes(TB, D, Hp)),
        cost_estimate=cost,
    )(x, we_t, wd, cp_row, m)

    return jnp.sum(partial[:, 0, 0]) * (1.0 / B)


def expectation_recon_loss(x, w_enc, w_dec, cum_probs, l_mask, *, tile_b=None):
    if tile_b is None:
        tile_b = _default_tile_b()
    return _expectation_loss_impl(x, w_enc, w_dec, cum_probs, l_mask,
                                  tile_b=int(tile_b))


# ----------------------------------------------------------------------------
# Module-equivalent parameter construction (deterministic, in-script).
# ----------------------------------------------------------------------------
def build_params(key, input_dim, hidden_dim, init_scale=0.001):
    k_enc, k_dec = jax.random.split(key)
    w_enc = init_scale * jax.random.normal(k_enc, (hidden_dim, input_dim), jnp.float32)
    w_dec = init_scale * jax.random.normal(k_dec, (input_dim, hidden_dim), jnp.float32)

    geom_p = 0.9
    prior_probs = [geom_p ** b * (1.0 - geom_p) for b in range(hidden_dim - 1)]
    prior_probs.append(1.0 - sum(prior_probs))
    prior_probs = np.asarray(prior_probs, dtype=np.float32)

    cum_probs = np.asarray(
        [1.0 - float(np.sum(prior_probs[:i])) for i in range(hidden_dim)],
        dtype=np.float32,
    )
    diag_expected_mask = np.diag(cum_probs).astype(np.float32)

    l_expected_mask = np.zeros((hidden_dim, hidden_dim), dtype=np.float32)
    for i in range(hidden_dim):
        l_expected_mask[i, i] = cum_probs[i]
        l_expected_mask[:i, i] = cum_probs[i]
        l_expected_mask[i, :i] = cum_probs[i]

    return dict(
        w_enc=w_enc,
        w_dec=w_dec,
        prior_probs=jnp.asarray(prior_probs),
        cum_probs=jnp.asarray(cum_probs),
        diag_expected_mask=jnp.asarray(diag_expected_mask),
        l_expected_mask=jnp.asarray(l_expected_mask),
    )


# Pure-JAX references (mirror the PyTorch forward) for sanity checks.
def _ref_sampled_loss(x, w_enc, w_dec, prior_inds):
    h = x @ w_enc.T
    j = jnp.arange(h.shape[1])[None, :]
    mask = (j <= prior_inds[:, None]).astype(h.dtype)
    recon = (h * mask) @ w_dec.T
    return jnp.sum((x - recon) ** 2) / x.shape[0]


def _ref_expectation_loss(x, w_enc, w_dec, diag_mask, l_mask):
    tr_xtx = jnp.sum(x ** 2)
    w1_x = (x @ w_enc.T).T
    tr_xt_w2_y = jnp.trace(w1_x @ x @ w_dec @ diag_mask)
    w2t_w2_masked = (w_dec.T @ w_dec) * l_mask
    tr_yt = jnp.trace(w1_x @ w1_x.T @ w2t_w2_masked)
    return (tr_xtx - 2.0 * tr_xt_w2_y + tr_yt) / x.shape[0]


if __name__ == "__main__":
    key = jax.random.PRNGKey(0)
    k_param, k_x, k_sample = jax.random.split(key, 3)

    batch, input_dim, hidden_dim = 8, 128, 32
    params = build_params(k_param, input_dim, hidden_dim, init_scale=0.001)
    x = jax.random.normal(k_x, (batch, input_dim), jnp.float32)

    # torch.multinomial(prior_probs, B, replacement=True) equivalent.
    prior_inds = jax.random.categorical(
        k_sample, jnp.log(params["prior_probs"]), shape=(batch,)
    ).astype(jnp.int32)

    # Default forward path (use_expectation=False).
    loss = nested_dropout_recon_loss(x, params["w_enc"], params["w_dec"], prior_inds)
    loss = jax.block_until_ready(loss)
    ref = _ref_sampled_loss(x, params["w_enc"], params["w_dec"], prior_inds)
    assert np.allclose(np.asarray(loss), np.asarray(ref), rtol=1e-4, atol=1e-4), (
        loss, ref)

    # Expectation path (use_expectation=True).
    e_loss = expectation_recon_loss(
        x, params["w_enc"], params["w_dec"],
        params["cum_probs"], params["l_expected_mask"])
    e_loss = jax.block_until_ready(e_loss)
    e_ref = _ref_expectation_loss(
        x, params["w_enc"], params["w_dec"],
        params["diag_expected_mask"], params["l_expected_mask"])
    assert np.allclose(np.asarray(e_loss), np.asarray(e_ref), rtol=1e-4, atol=1e-4), (
        e_loss, e_ref)

    print("KERNEL_OK")
</pallas_src>

<mosaic_0001>
module attributes {stable_mosaic.version = 11 : i64} {
  func.func @_nested_dropout_loss_kernel(%arg0: i32, %arg1: memref<8x128xf32, #tpu.memory_space<vmem>>, %arg2: memref<128x128xbf16, #tpu.memory_space<vmem>>, %arg3: memref<128x128xbf16, #tpu.memory_space<vmem>>, %arg4: memref<128x128xbf16, #tpu.memory_space<vmem>>, %arg5: memref<8x1xi32, #tpu.memory_space<vmem>>, %arg6: memref<1x8x128xf32, #tpu.memory_space<vmem>>) attributes {dimension_semantics = [#tpu.dimension_semantics<parallel>], iteration_bounds = array<i64: 1>, scalar_prefetch = 0 : i64, scratch_operands = 0 : i64, tpu.core_type = #tpu.core_type<tc>, window_params = [{transform_indices = @transform_0, window_bounds = array<i64: 8, 128>}, {pipeline_mode = #tpu.pipeline_mode<synchronous>, transform_indices = @transform_1, window_bounds = array<i64: 128, 128>}, {pipeline_mode = #tpu.pipeline_mode<synchronous>, transform_indices = @transform_2, window_bounds = array<i64: 128, 128>}, {pipeline_mode = #tpu.pipeline_mode<synchronous>, transform_indices = @transform_3, window_bounds = array<i64: 128, 128>}, {transform_indices = @transform_4, window_bounds = array<i64: 8, 1>}, {transform_indices = @transform_5, window_bounds = array<i64: 1, 8, 128>}]} {
    %c0 = arith.constant 0 : index
    %c0_0 = arith.constant 0 : index
    %0 = vector.load %arg1[%c0, %c0_0] : memref<8x128xf32, #tpu.memory_space<vmem>>, vector<8x128xf32>
    %1 = arith.truncf %0 : vector<8x128xf32> to vector<8x128xbf16>
    %c0_1 = arith.constant 0 : index
    %c0_2 = arith.constant 0 : index
    %2 = vector.load %arg2[%c0_1, %c0_2] : memref<128x128xbf16, #tpu.memory_space<vmem>>, vector<128x128xbf16>
    %c0_3 = arith.constant 0 : index
    %c0_4 = arith.constant 0 : index
    %3 = vector.load %arg3[%c0_3, %c0_4] : memref<128x128xbf16, #tpu.memory_space<vmem>>, vector<128x128xbf16>
    %c0_5 = arith.constant 0 : index
    %c0_6 = arith.constant 0 : index
    %4 = vector.load %arg4[%c0_5, %c0_6] : memref<128x128xbf16, #tpu.memory_space<vmem>>, vector<128x128xbf16>
    %c0_7 = arith.constant 0 : index
    %c0_8 = arith.constant 0 : index
    %5 = vector.load %arg5[%c0_7, %c0_8] : memref<8x1xi32, #tpu.memory_space<vmem>>, vector<8x1xi32>
    %cst = arith.constant dense<0.000000e+00> : vector<8x128xf32>
    %6 = tpu.matmul %1, %2, %cst {dimension_numbers = #tpu.dot_dimension_numbers<[1], [0], [0], [1], [0, 0, 1, 1], [], []>} : vector<8x128xbf16>, vector<128x128xbf16>, vector<8x128xf32> -> vector<8x128xf32>
    %cst_9 = arith.constant dense<0.000000e+00> : vector<8x128xf32>
    %7 = tpu.matmul %1, %3, %cst_9 {dimension_numbers = #tpu.dot_dimension_numbers<[1], [0], [0], [1], [0, 0, 1, 1], [], []>} : vector<8x128xbf16>, vector<128x128xbf16>, vector<8x128xf32> -> vector<8x128xf32>
    %8 = tpu.iota {dimensions = array<i32: 1>} : vector<8x128xi32>
    %9 = vector.broadcast %5 : vector<8x1xi32> to vector<8x128xi32>
    %10 = arith.cmpi sle, %8, %9 : vector<8x128xi32>
    %cst_10 = arith.constant 0.000000e+00 : f32
    %11 = vector.broadcast %cst_10 : f32 to vector<8x128xf32>
    %12 = arith.select %10, %6, %11 : vector<8x128xi1>, vector<8x128xf32>
    %13 = arith.truncf %12 : vector<8x128xf32> to vector<8x128xbf16>
    %cst_11 = arith.constant dense<0.000000e+00> : vector<8x128xf32>
    %14 = tpu.matmul %13, %4, %cst_11 {dimension_numbers = #tpu.dot_dimension_numbers<[1], [0], [0], [1], [0, 0, 1, 1], [], []>} : vector<8x128xbf16>, vector<128x128xbf16>, vector<8x128xf32> -> vector<8x128xf32>
    %15 = arith.mulf %0, %0 : vector<8x128xf32>
    %16 = vector.shape_cast %15 : vector<8x128xf32> to vector<1x8x128xf32>
    %cst_12 = arith.constant dense<0.000000e+00> : vector<1xf32>
    %17 = vector.multi_reduction <add>, %16, %cst_12 [1, 2] : vector<1x8x128xf32> to vector<1xf32>
    %18 = vector.shape_cast %17 : vector<1xf32> to vector<1x1x1xf32>
    %19 = vector.extract %18[0, 0, 0] : f32 from vector<1x1x1xf32>
    %cst_13 = arith.constant 2.000000e+00 : f32
    %20 = vector.broadcast %cst_13 : f32 to vector<8x128xf32>
    %21 = arith.mulf %20, %7 : vector<8x128xf32>
    %22 = arith.subf %14, %21 : vector<8x128xf32>
    %23 = arith.mulf %12, %22 : vector<8x128xf32>
    %24 = vector.shape_cast %23 : vector<8x128xf32> to vector<1x8x128xf32>
    %cst_14 = arith.constant dense<0.000000e+00> : vector<1xf32>
    %25 = vector.multi_reduction <add>, %24, %cst_14 [1, 2] : vector<1x8x128xf32> to vector<1xf32>
    %26 = vector.shape_cast %25 : vector<1xf32> to vector<1x1x1xf32>
    %27 = vector.extract %26[0, 0, 0] : f32 from vector<1x1x1xf32>
    %28 = arith.addf %19, %27 : f32
    %29 = vector.broadcast %28 : f32 to vector<1x8x128xf32>
    %c0_15 = arith.constant 0 : index
    %c0_16 = arith.constant 0 : index
    %c0_17 = arith.constant 0 : index
    %30 = vector.load %arg6[%c0_15, %c0_16, %c0_17] : memref<1x8x128xf32, #tpu.memory_space<vmem>>, vector<1x8x128xf32>
    tpu.vector_store %arg6[%c0_15, %c0_16, %c0_17], %29 {strides = array<i32>} : memref<1x8x128xf32, #tpu.memory_space<vmem>>, vector<1x8x128xf32>,
    return
  }
  func.func @transform_0(%arg0: i32) -> (i32, i32) {
    %c0_i32 = arith.constant 0 : i32
    %c0_i32_0 = arith.constant 0 : i32
    return %arg0, %c0_i32 : i32, i32
  }
  func.func @transform_1(%arg0: i32) -> (i32, i32) {
    %c0_i32 = arith.constant 0 : i32
    %c0_i32_0 = arith.constant 0 : i32
    %c0_i32_1 = arith.constant 0 : i32
    return %c0_i32, %c0_i32_0 : i32, i32
  }
  func.func @transform_2(%arg0: i32) -> (i32, i32) {
    %c0_i32 = arith.constant 0 : i32
    %c0_i32_0 = arith.constant 0 : i32
    %c0_i32_1 = arith.constant 0 : i32
    return %c0_i32, %c0_i32_0 : i32, i32
  }
  func.func @transform_3(%arg0: i32) -> (i32, i32) {
    %c0_i32 = arith.constant 0 : i32
    %c0_i32_0 = arith.constant 0 : i32
    %c0_i32_1 = arith.constant 0 : i32
    return %c0_i32, %c0_i32_0 : i32, i32
  }
  func.func @transform_4(%arg0: i32) -> (i32, i32) {
    %c0_i32 = arith.constant 0 : i32
    %c0_i32_0 = arith.constant 0 : i32
    return %arg0, %c0_i32 : i32, i32
  }
  func.func @transform_5(%arg0: i32) -> (i32, i32, i32) {
    %c0_i32 = arith.constant 0 : i32
    %c0_i32_0 = arith.constant 0 : i32
    %c0_i32_1 = arith.constant 0 : i32
    return %arg0, %c0_i32, %c0_i32_0 : i32, i32, i32
  }
}

</mosaic_0001>

<bundles_post_ra>
// kernel: _sampled_loss_impl.1
= control target key start
LH: loop header
LB: loop body
LE: loop exit
PB: predicated region body
PF: predicated region fallthrough
CT: control target
= control target key end

     0   :  { %v420_v2 = vmov 0   ;;  %v193_v29 = vlaneseq  ;;  %s532_s1 = inlined_call_operand.vmem [shape: bf16[128,128], index: 1, kind: input, shape index: {}]   ;;  %s533_s4 = inlined_call_operand.vmem [shape: s32[8,1], index: 4, kind: input, shape index: {}]   ;;  %s534_s2 = inlined_call_operand.vmem [shape: bf16[128,128], index: 2, kind: input, shape index: {}]   ;;  %s535_s3 = inlined_call_operand.vmem [shape: bf16[128,128], index: 3, kind: input, shape index: {}]   ;;  %s536_s0 = inlined_call_operand.vmem [shape: f32[8,128], index: 0, kind: input, shape index: {}]   ;;  %s537_s5 = inlined_call_operand.vmem [shape: f32[1,8,128], index: 5, kind: output, shape index: {}]  }
   0x1   :  { %v397_v0 = vld [vmem:[%s532_s1 + $0x38] sm:$0xff]  ;;  %v396_v1 = vld [vmem:[%s532_s1 + $0x30] sm:$0xff]  ;;  %419 = vset.pattern.permute.xlu0 %v420_v2  ;;  %v70_v3 = vld [vmem:[%s533_s4] sm:$0xff] }
   0x2   :  { %119 = vmatpush.bf16.msra.mxu0 %v397_v0  ;;  %v405_v4 = vld [vmem:[%s534_s2 + $0x38] sm:$0xff]  ;;  %196 = vperm.xlu0 %419, %v70_v3   ;;  %v404_v6 = vld [vmem:[%s534_s2 + $0x30] sm:$0xff]  ;;  %v395_v7 = vld [vmem:[%s532_s1 + $0x28] sm:$0xff]  ;;  %v194_v30 = vand.u32 127, %v193_v29 }
   0x3   :  { %v413_v5 = vld [vmem:[%s535_s3 + $0x38] sm:$0xff]  ;;  %180 = vmatpush.bf16.msra.mxu1 %v405_v4  ;;  %v412_v8 = vld [vmem:[%s535_s3 + $0x30] sm:$0xff]  ;;  %v403_v9 = vld [vmem:[%s534_s2 + $0x28] sm:$0xff] }
   0x4   :  { %249 = vmatpush.bf16.msra.mxu2 %v413_v5  ;;  %v394_v10 = vld [vmem:[%s532_s1 + $0x20] sm:$0xff]  ;;  %v411_v11 = vld [vmem:[%s535_s3 + $0x28] sm:$0xff]  ;;  %v393_v13 = vld [vmem:[%s532_s1 + $0x18] sm:$0xff] }
   0x5   :  { %v402_v12 = vld [vmem:[%s534_s2 + $0x20] sm:$0xff]  ;;  %v401_v15 = vld [vmem:[%s534_s2 + $0x18] sm:$0xff]  ;;  %v392_v16 = vld [vmem:[%s532_s1 + $0x10] sm:$0xff] }
   0x6   :  { %120 = vmatpush.bf16.msra.mxu0 %v396_v1  ;;  %v410_v14 = vld [vmem:[%s535_s3 + $0x20] sm:$0xff]  ;;  %v409_v17 = vld [vmem:[%s535_s3 + $0x18] sm:$0xff]  ;;  %v400_v18 = vld [vmem:[%s534_s2 + $0x10] sm:$0xff] }
   0x7   :  { %181 = vmatpush.bf16.msra.mxu1 %v404_v6  ;;  %v391_v19 = vld [vmem:[%s532_s1 + $0x8] sm:$0xff]  ;;  %v408_v20 = vld [vmem:[%s535_s3 + $0x10] sm:$0xff]  ;;  %v390_v22 = vld [vmem:[%s532_s1] sm:$0xff] }
   0x8   :  { %250 = vmatpush.bf16.msra.mxu2 %v412_v8  ;;  %v399_v21 = vld [vmem:[%s534_s2 + $0x8] sm:$0xff]  ;;  %v20_v23 = vld [vmem:[%s536_s0] sm:$0xff] }
   0x9   :  { %v407_v24 = vld [vmem:[%s535_s3 + $0x8] sm:$0xff]  ;;  %v21_v25 = vpack.c.bf16 %v20_v23, %v20_v23  ;;  %v398_v26 = vld [vmem:[%s534_s2] sm:$0xff]  ;;  %v262_v28 = vmul.f32 %v20_v23, %v20_v23 }
   0xa   :  { %121 = vmatpush.bf16.msra.mxu0 %v395_v7  ;;  %v406_v27 = vld [vmem:[%s535_s3] sm:$0xff] }
   0xb   :  { %182 = vmatpush.bf16.msra.mxu1 %v403_v9 }
   0xc   :  { %251 = vmatpush.bf16.msra.mxu2 %v411_v11 }
   0xe   :  { %122 = vmatpush.bf16.msra.mxu0 %v394_v10 }
   0xf   :  { %183 = vmatpush.bf16.msra.mxu1 %v402_v12 }
  0x10   :  { %252 = vmatpush.bf16.msra.mxu2 %v410_v14 }
  0x12   :  { %123 = vmatpush.bf16.msra.mxu0 %v393_v13 }
  0x13   :  { %184 = vmatpush.bf16.msra.mxu1 %v401_v15 }
  0x14   :  { %253 = vmatpush.bf16.msra.mxu2 %v409_v17 }
  0x16   :  { %124 = vmatpush.bf16.msra.mxu0 %v392_v16 }
  0x17   :  { %185 = vmatpush.bf16.msra.mxu1 %v400_v18 }
  0x18   :  { %254 = vmatpush.bf16.msra.mxu2 %v408_v20 }
  0x1a   :  { %125 = vmatpush.bf16.msra.mxu0 %v391_v19 }
  0x1b   :  { %186 = vmatpush.bf16.msra.mxu1 %v399_v21 }
  0x1c   :  { %255 = vmatpush.bf16.msra.mxu2 %v407_v24 }
  0x1e   :  { %126 = vmatpush.bf16.msra.mxu0 %v390_v22 }
  0x1f   :  { %187 = vmatpush.bf16.msra.mxu1 %v398_v26 }
  0x20   :  { %256 = vmatpush.bf16.msra.mxu2 %v406_v27 }
  0x21   :  { %127 = vmatmul.bf16.vlgmr.msra.gmra.mxu0 %v21_v25 }
  0x22   :  { %188 = vmatmul.bf16.vlgmr.msra.gmra.mxu1 %v21_v25 }
  0x2c   :  { %263 = vadd.xlane.f32.xlu0 %v262_v28 }
  0x74   :  { %v197_v31 = vpop.permute.xlu0 %196 }
  0x75   :  { %vm198_vm0 = vcmp.le.s32.totalorder %v194_v30, %v197_v31 }
  0x76   :  { %vm387_vm1 = vmpackc.low %vm198_vm0, %vm198_vm0 }
  0x9e   :  { %v128_v32 = vpop.f32.mrf.mxu0 }
  0x9f   :  { %v388_v33 = vpack.c.bf16 %v128_v32, %v128_v32  ;;  %v199_v34 = vsel %vm198_vm0, %v128_v32, 0.0  ;;  %v189_v35 = vpop.f32.mrf.mxu1  ;;  %v264_v43 = vpop.xlane.xlu0 %263 }
  0xa0   :  { %v272_v38 = vmul.f32 2.0, %v189_v35  ;;  %v265_v44 = vrot.slane %v264_v43, 4 }
  0xa1   :  { %389 = vmatmul.msk.bf16.vlgmr.msra.gmra.mxu2 %vm387_vm1, %v388_v33 }
  0xa2   :  { %v266_v45 = vadd.f32 %v265_v44, %v264_v43 }
  0xa4   :  { %v267_v46 = vrot.slane %v266_v45, 2 }
  0xa6   :  { %v130_v36 = vpop.f32.mrf.mxu0  ;;  %v268_v47 = vadd.f32 %v267_v46, %v266_v45 }
  0xa7   :  { %v191_v37 = vpop.f32.mrf.mxu1 }
  0xa8   :  { %v269_v48 = vrot.slane %v268_v47, 1 }
  0xaa   :  { %v270_v49 = vadd.f32 %v269_v48, %v268_v47 }
  0xac   :  { %414 = vpush %v270_v49 }
  0xdd   :  { %s415_s0 = spop %414 }
 0x124   :  { %v258_v39 = vpop.f32.mrf.mxu2 }
 0x125   :  { %v273_v40 = vsub.f32 %v258_v39, %v272_v38 }
 0x127   :  { %v274_v41 = vmul.f32 %v273_v40, %v199_v34 }
 0x129   :  { %275 = vadd.xlane.f32.xlu1 %v274_v41 }
 0x12c   :  { %v260_v42 = vpop.f32.mrf.mxu2 }
 0x19c   :  { %v276_v50 = vpop.xlane.xlu1 %275 }
 0x19d   :  { %v277_v51 = vrot.slane %v276_v50, 4 }
 0x19f   :  { %v278_v52 = vadd.f32 %v277_v51, %v276_v50 }
 0x1a1   :  { %v279_v53 = vrot.slane %v278_v52, 2 }
 0x1a3   :  { %v280_v54 = vadd.f32 %v279_v53, %v278_v52 }
 0x1a5   :  { %v281_v55 = vrot.slane %v280_v54, 1 }
 0x1a7   :  { %v282_v56 = vadd.f32 %v281_v55, %v280_v54 }
 0x1a9   :  { %416 = vpush %v282_v56 }
 0x1da   :  { %s417_s2 = spop %416 }
 0x1db   :  { %s284_s3 = sadd.f32 %s417_s2, %s415_s0 }
 0x1dd   :  { %v285_v57 = vstv %s284_s3 }
 0x1de   :  { %286 = vst [vmem:[%s537_s5] sm:$0xff] %v285_v57 }

</bundles_post_ra>
